<compile_context>
chip_gen: v5e
topology: v5e:2x2
jax: 0.10.0
libtpu: 0.0.40
codegen_flags: <defaults>
</compile_context>

<pallas_src>
import functools

import jax
import jax.numpy as jnp
from jax.experimental import pallas as pl
from jax.experimental.pallas import tpu as pltpu


def _kldiv_kernel(logits_ref, targets_ref, out_ref, *, inv_T):
    # One (tile_rows, C) batch tile per grid step; emit a per-tile partial sum.
    x = logits_ref[...].astype(jnp.float32) * inv_T
    t = targets_ref[...].astype(jnp.float32) * inv_T

    # Student log-softmax normalizer (only the per-row logZ is needed).
    xmax = jnp.max(x, axis=-1, keepdims=True)
    xs = x - xmax
    log_zx = jnp.log(jnp.sum(jnp.exp(xs), axis=-1, keepdims=True))

    # Teacher softmax, reusing exp(ts) for both Z_t and the weighted sum.
    tmax = jnp.max(t, axis=-1, keepdims=True)
    ts = t - tmax
    e_t = jnp.exp(ts)
    z_t = jnp.sum(e_t, axis=-1, keepdims=True)
    log_zt = jnp.log(z_t)

    # sum_c p*(log p - q) per row, factored so p is never formed per element:
    #   p = e_t / Z_t ; log p - q = (ts - xs) + (logZx - logZt)
    #   => row_kl = sum_c e_t*(ts - xs) / Z_t + (logZx - logZt)
    num = jnp.sum(e_t * (ts - xs), axis=-1, keepdims=True)
    row_kl = num / z_t + (log_zx - log_zt)          # (tile_rows, 1)

    partial = jnp.sum(row_kl)                       # scalar for this tile
    # Lane-dense (1, 8, 128) output block; every element holds the tile's
    # partial sum, the wrapper reads [:, 0, 0].  Distinct block per grid step
    # -> safe under "parallel" (megacore) semantics.
    out_ref[...] = jnp.zeros(out_ref.shape, jnp.float32) + partial


def _round_up(x, m):
    return (x + m - 1) // m * m


def _pick_tile_rows(n_rows, n_cols, itemsize, input_buffer_budget_bytes):
    """Largest batch tile whose double-buffered inputs fit the VMEM budget."""
    # 2 inputs x 2 pipeline buffers of (tile_rows, n_cols) each.
    per_row_bytes = 4 * n_cols * itemsize
    rows = max(8, input_buffer_budget_bytes // per_row_bytes)
    rows = min(rows, 2048)                       # bound in-kernel f32 temps
    rows = min(rows, _round_up(n_rows, 8))       # don't tile past the batch
    return max(8, (rows // 8) * 8)               # sublane-aligned


def kldiv_pallas(
    logits,
    targets,
    T=1.0,
    reduction="batchmean",
    tile_rows=None,
    input_buffer_budget_bytes=24 * 1024 * 1024,  # double-buffered input set
    vmem_limit_bytes=48 * 1024 * 1024,           # safe on v5e/v6e (128 MiB) and v7x (64 MiB)
):
    """Pallas implementation of kldiv(logits, targets, T, reduction)."""
    # TODO(synk): only 'batchmean' (the module default) is implemented.
    assert reduction == "batchmean"
    assert logits.shape == targets.shape and logits.ndim == 2
    N, C = logits.shape
    itemsize = jnp.dtype(logits.dtype).itemsize

    if tile_rows is None:
        tile_rows = _pick_tile_rows(N, C, itemsize, input_buffer_budget_bytes)

    # Ragged batch: pad BOTH inputs with zero rows.  For identical padded rows
    # p == q (uniform softmax), so their KL contribution is exactly 0.
    n_pad = _round_up(N, tile_rows)
    if n_pad != N:
        pad = n_pad - N
        logits = jnp.pad(logits, ((0, pad), (0, 0)))
        targets = jnp.pad(targets, ((0, pad), (0, 0)))
    num_tiles = n_pad // tile_rows

    kern = functools.partial(_kldiv_kernel, inv_T=1.0 / float(T))
    partials = pl.pallas_call(
        kern,
        out_shape=jax.ShapeDtypeStruct((num_tiles, 8, 128), jnp.float32),
        grid_spec=pltpu.PrefetchScalarGridSpec(
            num_scalar_prefetch=0,
            grid=(num_tiles,),
            in_specs=[
                # NOTE: if profiling shows exposed DMA at large tiles, add
                # pipeline_mode=pl.Buffered(3) here (watch VMEM on v7x).
                pl.BlockSpec((tile_rows, C), lambda i: (i, 0)),
                pl.BlockSpec((tile_rows, C), lambda i: (i, 0)),
            ],
            out_specs=pl.BlockSpec((1, 8, 128), lambda i: (i, 0, 0)),
        ),
        compiler_params=pltpu.CompilerParams(
            dimension_semantics=("parallel",),
            vmem_limit_bytes=vmem_limit_bytes,
        ),
    )(logits, targets)

    # Tiny cross-tile reduction done in plain JAX; 'batchmean' divides by the
    # ORIGINAL batch size N, then scale by T*T as in the module.
    total = jnp.sum(partials[:, 0, 0])
    return total / N * (float(T) * float(T))


def _kldiv_ref(logits, targets, T=1.0):
    # pure-JAX reference for sanity checking
    q = jax.nn.log_softmax(logits / T, axis=1)
    logp = jax.nn.log_softmax(targets / T, axis=1)
    p = jnp.exp(logp)
    return jnp.sum(p * (logp - q)) / logits.shape[0] * (T * T)


if __name__ == "__main__":
    key = jax.random.PRNGKey(0)
    k1, k2 = jax.random.split(key)
    N, C = 16, 32  # small synthetic shapes: batch=16, classes=32
    T = 2.0

    logits = jax.random.normal(k1, (N, C), dtype=jnp.float32)
    targets = jax.random.normal(k2, (N, C), dtype=jnp.float32)

    # f32 path
    out = jax.block_until_ready(kldiv_pallas(logits, targets, T=T))
    ref = _kldiv_ref(logits, targets, T=T)
    assert jnp.allclose(out, ref, rtol=1e-4, atol=1e-5), (out, ref)

    # ragged batch (exercises the zero-row padding path)
    out2 = jax.block_until_ready(kldiv_pallas(logits[:13], targets[:13], T=T))
    ref2 = _kldiv_ref(logits[:13], targets[:13], T=T)
    assert jnp.allclose(out2, ref2, rtol=1e-4, atol=1e-5), (out2, ref2)

    # bf16 inputs (bandwidth optimization); in-kernel math stays in f32
    lb, tb = logits.astype(jnp.bfloat16), targets.astype(jnp.bfloat16)
    out3 = jax.block_until_ready(kldiv_pallas(lb, tb, T=T))
    ref3 = _kldiv_ref(lb.astype(jnp.float32), tb.astype(jnp.float32), T=T)
    assert jnp.allclose(out3, ref3, rtol=1e-3, atol=1e-4), (out3, ref3)

    print("KERNEL_OK")
</pallas_src>

<mosaic_0001>
module attributes {stable_mosaic.version = 11 : i64} {
  func.func @_kldiv_kernel(%arg0: i32, %arg1: memref<16x32xf32, #tpu.memory_space<vmem>>, %arg2: memref<16x32xf32, #tpu.memory_space<vmem>>, %arg3: memref<1x8x128xf32, #tpu.memory_space<vmem>>) attributes {dimension_semantics = [#tpu.dimension_semantics<parallel>], iteration_bounds = array<i64: 1>, scalar_prefetch = 0 : i64, scratch_operands = 0 : i64, tpu.core_type = #tpu.core_type<tc>, window_params = [{transform_indices = @transform_0, window_bounds = array<i64: 16, 32>}, {transform_indices = @transform_1, window_bounds = array<i64: 16, 32>}, {transform_indices = @transform_2, window_bounds = array<i64: 1, 8, 128>}]} {
    %c0 = arith.constant 0 : index
    %c0_0 = arith.constant 0 : index
    %0 = vector.load %arg1[%c0, %c0_0] : memref<16x32xf32, #tpu.memory_space<vmem>>, vector<16x32xf32>
    %cst = arith.constant 5.000000e-01 : f32
    %1 = vector.broadcast %cst : f32 to vector<16x32xf32>
    %2 = arith.mulf %0, %1 : vector<16x32xf32>
    %c0_1 = arith.constant 0 : index
    %c0_2 = arith.constant 0 : index
    %3 = vector.load %arg2[%c0_1, %c0_2] : memref<16x32xf32, #tpu.memory_space<vmem>>, vector<16x32xf32>
    %cst_3 = arith.constant 5.000000e-01 : f32
    %4 = vector.broadcast %cst_3 : f32 to vector<16x32xf32>
    %5 = arith.mulf %3, %4 : vector<16x32xf32>
    %cst_4 = arith.constant dense<0xFF800000> : vector<16xf32>
    %6 = vector.multi_reduction <maximumf>, %2, %cst_4 [1] : vector<16x32xf32> to vector<16xf32>
    %7 = vector.shape_cast %6 : vector<16xf32> to vector<16x1xf32>
    %8 = vector.broadcast %7 : vector<16x1xf32> to vector<16x32xf32>
    %9 = arith.subf %2, %8 : vector<16x32xf32>
    %10 = math.exp %9 : vector<16x32xf32>
    %cst_5 = arith.constant dense<0.000000e+00> : vector<16xf32>
    %11 = vector.multi_reduction <add>, %10, %cst_5 [1] : vector<16x32xf32> to vector<16xf32>
    %12 = vector.shape_cast %11 : vector<16xf32> to vector<16x1xf32>
    %13 = math.log %12 : vector<16x1xf32>
    %cst_6 = arith.constant dense<0xFF800000> : vector<16xf32>
    %14 = vector.multi_reduction <maximumf>, %5, %cst_6 [1] : vector<16x32xf32> to vector<16xf32>
    %15 = vector.shape_cast %14 : vector<16xf32> to vector<16x1xf32>
    %16 = vector.broadcast %15 : vector<16x1xf32> to vector<16x32xf32>
    %17 = arith.subf %5, %16 : vector<16x32xf32>
    %18 = math.exp %17 : vector<16x32xf32>
    %cst_7 = arith.constant dense<0.000000e+00> : vector<16xf32>
    %19 = vector.multi_reduction <add>, %18, %cst_7 [1] : vector<16x32xf32> to vector<16xf32>
    %20 = vector.shape_cast %19 : vector<16xf32> to vector<16x1xf32>
    %21 = math.log %20 : vector<16x1xf32>
    %22 = arith.subf %17, %9 : vector<16x32xf32>
    %23 = arith.mulf %18, %22 : vector<16x32xf32>
    %cst_8 = arith.constant dense<0.000000e+00> : vector<16xf32>
    %24 = vector.multi_reduction <add>, %23, %cst_8 [1] : vector<16x32xf32> to vector<16xf32>
    %25 = vector.shape_cast %24 : vector<16xf32> to vector<16x1xf32>
    %26 = arith.divf %25, %20 : vector<16x1xf32>
    %27 = arith.subf %13, %21 : vector<16x1xf32>
    %28 = arith.addf %26, %27 : vector<16x1xf32>
    %29 = vector.shape_cast %28 : vector<16x1xf32> to vector<1x16x1xf32>
    %cst_9 = arith.constant dense<0.000000e+00> : vector<1xf32>
    %30 = vector.multi_reduction <add>, %29, %cst_9 [1, 2] : vector<1x16x1xf32> to vector<1xf32>
    %31 = vector.shape_cast %30 : vector<1xf32> to vector<1x1x1xf32>
    %32 = vector.extract %31[0, 0, 0] : f32 from vector<1x1x1xf32>
    %cst_10 = arith.constant 0.000000e+00 : f32
    %33 = vector.broadcast %cst_10 : f32 to vector<1x8x128xf32>
    %34 = vector.broadcast %32 : f32 to vector<1x8x128xf32>
    %35 = arith.addf %33, %34 : vector<1x8x128xf32>
    %c0_11 = arith.constant 0 : index
    %c0_12 = arith.constant 0 : index
    %c0_13 = arith.constant 0 : index
    %36 = vector.load %arg3[%c0_11, %c0_12, %c0_13] : memref<1x8x128xf32, #tpu.memory_space<vmem>>, vector<1x8x128xf32>
    tpu.vector_store %arg3[%c0_11, %c0_12, %c0_13], %35 {strides = array<i32>} : memref<1x8x128xf32, #tpu.memory_space<vmem>>, vector<1x8x128xf32>,
    return
  }
  func.func @transform_0(%arg0: i32) -> (i32, i32) {
    %c0_i32 = arith.constant 0 : i32
    %c0_i32_0 = arith.constant 0 : i32
    return %arg0, %c0_i32 : i32, i32
  }
  func.func @transform_1(%arg0: i32) -> (i32, i32) {
    %c0_i32 = arith.constant 0 : i32
    %c0_i32_0 = arith.constant 0 : i32
    return %arg0, %c0_i32 : i32, i32
  }
  func.func @transform_2(%arg0: i32) -> (i32, i32, i32) {
    %c0_i32 = arith.constant 0 : i32
    %c0_i32_0 = arith.constant 0 : i32
    %c0_i32_1 = arith.constant 0 : i32
    return %arg0, %c0_i32, %c0_i32_0 : i32, i32, i32
  }
}

</mosaic_0001>

<bundles_post_ra>
// kernel: tpu_custom_call.1
= control target key start
LH: loop header
LB: loop body
LE: loop exit
PB: predicated region body
PF: predicated region fallthrough
CT: control target
= control target key end

     0   :  { %7 = vsyncpa [#allocation3], 0  ;;  %s319_s0 = inlined_call_operand.hbm [shape: f32[16,32], index: 0, kind: input, shape index: {}]   ;;  %s320_s1 = inlined_call_operand.hbm [shape: f32[16,32], index: 1, kind: input, shape index: {}]   ;;  %s321_s2 = inlined_call_operand.hbm [shape: f32[1,8,128], index: 2, kind: output, shape index: {}]  }
   0x1   :  { %8 = vsyncpa [#allocation6], 0 }
   0x2   :  { %9 = vsyncpa [#allocation4], 0  ;;  %s14_s11 = sshll.u32 %s319_s0, 4  ;;  %s280_s12 = smov [#allocation2]   ;;  %s15_s11 = int_to_ptr.hbm [resolvable:$true] %s14_s11 }
   0x3   :  { %s16_s13 = sshll.u32 %s280_s12, 4  ;;  %s27_s16 = sshll.u32 %s320_s1, 4  ;;  %s17_s13 = int_to_ptr.vmem [resolvable:$true] %s16_s13  ;;  %s28_s16 = int_to_ptr.hbm [resolvable:$true] %s27_s16 }
   0x4   :  { %s281_s17 = smov 128   ;;  %s282_s18 = smov 8  }
   0x5   :  { %22 = dma.hbm_to_vmem [thread:$0]  %s15_s11, 256, %s17_s13, [#allocation3], %s281_s17, %s281_s17, %s282_s18  }
   0x6   :  { %s283_s19 = smov [#allocation5]  }
   0x7   :  { %s29_s20 = sshll.u32 %s283_s19, 4  ;;  %s30_s20 = int_to_ptr.vmem [resolvable:$true] %s29_s20 }
   0x8   :  { %35 = dma.hbm_to_vmem [thread:$0]  %s28_s16, 256, %s30_s20, [#allocation6], %s281_s17, %s281_s17, %s282_s18  }
   0x9   :  { %274 = dma.done.wait [#allocation3], 256  }
   0xa   :  { %275 = vsyncadd [#allocation3], 4294967040 }
   0xb   :  { %276 = dma.done.wait [#allocation6], 256  }
   0xc   :  { %277 = vsyncadd [#allocation6], 4294967040  ;;  %v48_v0 = vld [vmem:[#allocation5] sm:$0xff]  ;;  %vm52_vm0 = vcmask 261120   ;;  %v44_v1 = vld [vmem:[#allocation2] sm:$0xff]  ;;  %vm141_vm9 = vcmask 7168  }
   0xd   :  { %v50_v2 = vmul.f32 0.5, %v48_v0  ;;  %v46_v3 = vmul.f32 0.5, %v44_v1  ;;  %v49_v4 = vld [vmem:[#allocation5 + $0x8] sm:$0xff]  ;;  %v45_v5 = vld [vmem:[#allocation2 + $0x8] sm:$0xff]  ;;  %s164_s21 = sshll.u32 %s321_s2, 4  ;;  %s284_s22 = smov [#allocation7]   ;;  %s165_s21 = int_to_ptr.hbm [resolvable:$true] %s164_s21 }
   0xe   :  { %v51_v8 = vmul.f32 0.5, %v49_v4  ;;  %v47_v9 = vmul.f32 0.5, %v45_v5  ;;  %s162_s23 = sshll.u32 %s284_s22, 4  ;;  %s163_s23 = int_to_ptr.vmem [resolvable:$true] %s162_s23 }
   0xf   :  { %v75_v6 = vsel %vm52_vm0, %v50_v2, -inf  ;;  %v53_v7 = vsel %vm52_vm0, %v46_v3, -inf }
  0x10   :  { %76 = vmax.xlane.f32.xlu0 %v75_v6  ;;  %54 = vmax.xlane.f32.xlu1 %v53_v7  ;;  %v78_v10 = vsel %vm52_vm0, %v51_v8, -inf  ;;  %v56_v11 = vsel %vm52_vm0, %v47_v9, -inf }
  0x18   :  { %79 = vmax.xlane.f32.xlu0 %v78_v10  ;;  %57 = vmax.xlane.f32.xlu1 %v56_v11 }
  0x83   :  { %v77_v12 = vpop.xlane.xlu0 %76  ;;  %v55_v13 = vpop.xlane.xlu1 %54 }
  0x84   :  { %v81_v14 = vsub.f32 %v50_v2, %v77_v12  ;;  %v59_v15 = vsub.f32 %v46_v3, %v55_v13 }
  0x86   :  { %v83_v16 = vmul.f32 1.442695, %v81_v14  ;;  %v61_v17 = vmul.f32 1.442695, %v59_v15  ;;  %v97_v34 = vsub.f32 %v81_v14, %v59_v15 }
  0x88   :  { %182 = vpow2.f32 %v83_v16 }
  0x89   :  { %184 = vpow2.f32 %v61_v17 }
  0x8b   :  { %v80_v18 = vpop.xlane.xlu0 %79  ;;  %v58_v19 = vpop.xlane.xlu1 %57 }
  0x8c   :  { %v82_v20 = vsub.f32 %v51_v8, %v80_v18  ;;  %v60_v21 = vsub.f32 %v47_v9, %v58_v19 }
  0x8e   :  { %v183_v22 = vpop.eup %182  ;;  %v85_v23 = vmul.f32 1.442695, %v82_v20  ;;  %v63_v24 = vmul.f32 1.442695, %v60_v21  ;;  %v98_v28 = vsub.f32 %v82_v20, %v60_v21 }
  0x8f   :  { %v185_v25 = vpop.eup %184  ;;  %v87_v26 = vsel %vm52_vm0, %v183_v22, 0.0  ;;  %v99_v36 = vmul.f32 %v183_v22, %v97_v34 }
  0x90   :  { %186 = vpow2.f32 %v85_v23  ;;  %88 = vadd.xlane.f32.xlu2 %v87_v26  ;;  %v65_v27 = vsel %vm52_vm0, %v185_v25, 0.0 }
  0x91   :  { %188 = vpow2.f32 %v63_v24  ;;  %66 = vadd.xlane.f32.xlu0 %v65_v27  ;;  %v101_v37 = vsel %vm52_vm0, %v99_v36, 0.0 }
  0x96   :  { %v187_v29 = vpop.eup %186 }
  0x97   :  { %v189_v30 = vpop.eup %188  ;;  %v90_v31 = vsel %vm52_vm0, %v187_v29, 0.0  ;;  %v100_v32 = vmul.f32 %v187_v29, %v98_v28 }
  0x98   :  { %91 = vadd.xlane.f32.xlu2 %v90_v31  ;;  %v68_v33 = vsel %vm52_vm0, %v189_v30, 0.0 }
  0x99   :  { %69 = vadd.xlane.f32.xlu1 %v68_v33  ;;  %v104_v35 = vsel %vm52_vm0, %v100_v32, 0.0 }
  0x9a   :  { %105 = vadd.xlane.f32.xlu0 %v104_v35 }
  0xa0   :  { %102 = vadd.xlane.f32.xlu2 %v101_v37 }
 0x103   :  { %v89_v38 = vpop.xlane.xlu2 %88 }
 0x104   :  { %190 = vrcp.f32 %v89_v38  ;;  %v67_v41 = vpop.xlane.xlu0 %66  ;;  %v118_v46 = vand.u32 2147483648, %v89_v38  ;;  %vm112_vm2 = vweird.f32 %v89_v38  ;;  %v116_v48 = vand.u32 2147483647, %v89_v38 }
 0x106   :  { %v119_v54 = vor.u32 1.1754944e-38, %v118_v46  ;;  %vm117_vm4 = vcmp.eq.f32.partialorder %v116_v48, 8.507059e+37 }
 0x10a   :  { %v191_v39 = vpop.eup %190 }
 0x10b   :  { %v108_v40 = vmul.f32 %v191_v39, %v89_v38  ;;  %v92_v42 = vpop.xlane.xlu2 %91  ;;  %vm113_vm1 = vweird.f32 %v191_v39 }
 0x10c   :  { %192 = vrcp.f32 %v92_v42  ;;  %v70_v43 = vpop.xlane.xlu1 %69  ;;  %vm114_vm3 = vmor %vm112_vm2, %vm113_vm1  ;;  %v133_v59 = vand.u32 2147483648, %v92_v42  ;;  %v131_v0 = vand.u32 2147483647, %v92_v42  ;;  %vm127_vm6 = vweird.f32 %v92_v42 }
 0x10d   :  { %194 = vlog2.f32 %v89_v38  ;;  %v109_v44 = vsub.f32 1.0, %v108_v40  ;;  %v106_v9 = vpop.xlane.xlu0 %105 }
 0x10e   :  { %196 = vlog2.f32 %v67_v41  ;;  %v134_v5 = vor.u32 1.1754944e-38, %v133_v59  ;;  %vm132_vm8 = vcmp.eq.f32.partialorder %v131_v0, 8.507059e+37 }
 0x10f   :  { %198 = vlog2.f32 %v92_v42  ;;  %v110_v45 = vmul.f32 %v191_v39, %v109_v44 }
 0x110   :  { %200 = vlog2.f32 %v70_v43 }
 0x111   :  { %v111_v47 = vadd.f32 %v191_v39, %v110_v45 }
 0x112   :  { %v193_v49 = vpop.eup %192 }
 0x113   :  { %v195_v50 = vpop.eup %194  ;;  %v123_v51 = vmul.f32 %v193_v49, %v92_v42  ;;  %v115_v52 = vsel %vm114_vm3, %v191_v39, %v111_v47  ;;  %v103_v61 = vpop.xlane.xlu2 %102  ;;  %vm128_vm5 = vweird.f32 %v193_v49 }
 0x114   :  { %v197_v53 = vpop.eup %196  ;;  %v94_v58 = vmul.f32 0.6931472, %v195_v50  ;;  %v120_v60 = vsel %vm117_vm4, %v119_v54, %v115_v52  ;;  %vm129_vm7 = vmor %vm127_vm6, %vm128_vm5 }
 0x115   :  { %v199_v55 = vpop.eup %198  ;;  %v124_v56 = vsub.f32 1.0, %v123_v51  ;;  %v72_v62 = vmul.f32 0.6931472, %v197_v53  ;;  %v121_v4 = vmul.f32 %v120_v60, %v103_v61 }
 0x116   :  { %v201_v57 = vpop.eup %200  ;;  %v96_v1 = vmul.f32 0.6931472, %v199_v55 }
 0x117   :  { %v125_v63 = vmul.f32 %v193_v49, %v124_v56  ;;  %v74_v2 = vmul.f32 0.6931472, %v201_v57  ;;  %v137_v6 = vsub.f32 %v72_v62, %v94_v58 }
 0x119   :  { %v126_v3 = vadd.f32 %v193_v49, %v125_v63  ;;  %v138_v10 = vsub.f32 %v74_v2, %v96_v1  ;;  %v139_v12 = vadd.f32 %v137_v6, %v121_v4 }
 0x11b   :  { %v130_v7 = vsel %vm129_vm7, %v193_v49, %v126_v3  ;;  %v142_v14 = vsel %vm141_vm9, %v139_v12, 0.0 }
 0x11c   :  { %v135_v8 = vsel %vm132_vm8, %v134_v5, %v130_v7 }
 0x11d   :  { %v136_v11 = vmul.f32 %v135_v8, %v106_v9 }
 0x11f   :  { %v140_v13 = vadd.f32 %v138_v10, %v136_v11 }
 0x121   :  { %v143_v15 = vsel %vm141_vm9, %v140_v13, 0.0 }
 0x122   :  { %v144_v16 = vadd.f32 %v143_v15, %v142_v14 }
 0x124   :  { %145 = vadd.xlane.f32.xlu1 %v144_v16 }
 0x197   :  { %v146_v17 = vpop.xlane.xlu1 %145 }
 0x198   :  { %v147_v18 = vrot.slane %v146_v17, 4 }
 0x19a   :  { %v148_v19 = vadd.f32 %v147_v18, %v146_v17 }
 0x19c   :  { %v149_v20 = vrot.slane %v148_v19, 2 }
 0x19e   :  { %v150_v21 = vadd.f32 %v149_v20, %v148_v19 }
 0x1a0   :  { %v151_v22 = vrot.slane %v150_v21, 1 }
 0x1a2   :  { %v152_v23 = vadd.f32 %v151_v22, %v150_v21 }
 0x1a4   :  { %175 = vpush %v152_v23 }
 0x1d5   :  { %s176_s24 = spop %175 }
 0x1d6   :  { %v154_v24 = vstv %s176_s24 }
 0x1d7   :  { %156 = vst [vmem:[#allocation7] sm:$0xff] %v154_v24 }
 0x1d8   :  { %167 = dma.vmem_to_hbm [thread:$0]  %s163_s23, 128, %s165_s21, [#allocation4]  }
 0x1d9   :  { %278 = dma.done.wait [#allocation4], 128  }
 0x1da   :  { %279 = vsyncadd [#allocation4], 4294967168 }
 0x1db   :  { %172 = vsyncpa [#allocation3], 1 }
 0x1dc   :  { %173 = vsyncpa [#allocation6], 1 }
 0x1dd   :  { %174 = vsyncpa [#allocation4], 1 }

</bundles_post_ra>
